<compile_context>
chip_gen: v7x
topology: tpu7x:2x2x1
jax: 0.10.0
libtpu: 0.0.40
codegen_flags: <defaults>
</compile_context>

<pallas_src>
import functools

import jax
import jax.numpy as jnp
from jax.experimental import pallas as pl
from jax.experimental.pallas import tpu as pltpu


# --------------------------------------------------------------------------- #
# Kernel
# --------------------------------------------------------------------------- #
def _ffn_kernel(*refs, eps: float, has_residual: bool, n_h: int):
    if n_h > 1:
        *main_refs, h_scr, acc_scr = refs
    else:
        *main_refs, h_scr = refs
        acc_scr = None

    if has_residual:
        (x_ref, res_in_ref, wn_ref, w1y_ref, w1g_ref, b1y_ref, b1g_ref,
         w2_ref, b2_ref, out_ref, res_out_ref) = main_refs
    else:
        (x_ref, wn_ref, w1y_ref, w1g_ref, b1y_ref, b1g_ref,
         w2_ref, b2_ref, out_ref, res_out_ref) = main_refs
        res_in_ref = None

    j = pl.program_id(1)

    # ---- once per token block: fused add + RMSNorm, cache normalized acts ----
    @pl.when(j == 0)
    def _():
        x = x_ref[...].astype(jnp.float32)
        if has_residual:
            res = x + res_in_ref[...].astype(jnp.float32)
        else:
            res = x
        res_out_ref[...] = res                               # residual in fp32
        var = jnp.mean(res * res, axis=-1, keepdims=True)
        h = res * jax.lax.rsqrt(var + eps) * wn_ref[...].astype(jnp.float32)
        h_scr[...] = h.astype(jnp.bfloat16)                  # bf16 for the MXU

    # ---- per hidden tile: fc1 slice -> SiLU gating -> fc2 partial ------------
    h = h_scr[...]                                           # (tm, D) bf16
    y = jnp.dot(h, w1y_ref[...], preferred_element_type=jnp.float32) + b1y_ref[...]
    gate = jnp.dot(h, w1g_ref[...], preferred_element_type=jnp.float32) + b1g_ref[...]
    g = y * (gate * jax.nn.sigmoid(gate))                    # f32 gating (silu)
    partial = jnp.dot(g.astype(jnp.bfloat16), w2_ref[...],
                      preferred_element_type=jnp.float32)    # (tm, D) f32

    if n_h == 1:
        out_ref[...] = (partial + b2_ref[...].astype(jnp.float32)
                        ).astype(out_ref.dtype)
    else:
        @pl.when(j == 0)
        def _():
            acc_scr[...] = partial                           # init with first partial

        @pl.when((j > 0) & (j < n_h - 1))
        def _():
            acc_scr[...] += partial

        @pl.when(j == n_h - 1)
        def _():
            out_ref[...] = (acc_scr[...] + partial
                            + b2_ref[...].astype(jnp.float32)).astype(out_ref.dtype)


# --------------------------------------------------------------------------- #
# Helpers
# --------------------------------------------------------------------------- #
def _round_up(x: int, m: int) -> int:
    return (x + m - 1) // m * m


def _pick_tile(total: int, max_tile: int, align: int = 128) -> int:
    """Largest divisor of `total` that is a multiple of `align` and <= max_tile."""
    t = min(max_tile, total)
    t = max((t // align) * align, align)
    while t > align and total % t != 0:
        t -= align
    return t


def _vmem_capacity_bytes() -> int:
    try:
        info = pltpu.get_tpu_info()
        for attr in ("vmem_capacity_bytes", "vmem_size_bytes"):
            cap = getattr(info, attr, None)
            if cap:
                return int(cap)
    except Exception:
        pass
    return 64 << 20          # conservative fallback (safe on every generation)


def prepare_params(params):
    """One-time cast of weights to their kernel dtypes (call once, reuse).

    Keeps fc1 fused (D, 2H); the kernel addresses value/gate halves via two
    BlockSpecs on the same array, so no per-call slicing/copying happens.
    """
    return {
        "norm_w": params["norm_w"].astype(jnp.float32),
        "w1": params["w1"].astype(jnp.bfloat16),     # (D, 2H) fused
        "b1": params["b1"].astype(jnp.float32),      # (1, 2H) fused
        "w2": params["w2"].astype(jnp.bfloat16),     # (H, D)
        "b2": params["b2"].astype(jnp.float32),      # (1, D)
    }


# --------------------------------------------------------------------------- #
# Wrapper
# --------------------------------------------------------------------------- #
def feedforward_wrapper(hidden_states, params, residual=None, *,
                        eps: float = 1e-5,
                        block_tokens: int = 512,
                        block_hidden: int | None = None):
    """hidden_states: [B, S, D]. Returns (out [B,S,D] in input dtype,
    residual [B,S,D] in fp32)."""
    B, S, D = hidden_states.shape

    # Accept raw (fp32) params too, but the fast path is pre-prepared params.
    if params["w1"].dtype != jnp.bfloat16:
        params = prepare_params(params)
    wn, w1, b1, w2, b2 = (params["norm_w"], params["w1"], params["b1"],
                          params["w2"], params["b2"])
    H = w2.shape[0]
    assert w1.shape == (D, 2 * H) and b1.shape == (1, 2 * H)
    assert w2.shape == (H, D) and b2.shape == (1, D)
    assert H % 128 == 0, "hidden dim must be lane-aligned"

    has_residual = residual is not None
    x_itemsize = jnp.dtype(hidden_states.dtype).itemsize
    res_itemsize = jnp.dtype(residual.dtype).itemsize if has_residual else 0

    # ---- generation-aware tile selection -------------------------------------
    vmem_cap = _vmem_capacity_bytes()
    small_vmem = vmem_cap <= (96 << 20)          # v7x: 64 MiB per TensorCore
    if block_hidden is None:
        block_hidden = 256 if small_vmem else 1024

    T = B * S
    tm = max(min(block_tokens, _round_up(T, 16)), 16)   # >=16 for bf16 h_scr tile
    th = _pick_tile(H, block_hidden)

    def _needed_bytes(tm_, th_):
        act = tm_ * D
        per_step = (act * x_itemsize                      # x tile
                    + act * res_itemsize                  # residual in tile
                    + D * 4                               # norm weight
                    + 2 * D * th_ * 2                     # W1 value + gate tiles (bf16)
                    + 2 * th_ * 4                         # b1 tiles
                    + th_ * D * 2                         # W2 row tile (bf16)
                    + D * 4                               # b2
                    + act * x_itemsize                    # out tile
                    + act * 4)                            # residual out tile (f32)
        scratch = act * 2 + (act * 4 if H // th_ > 1 else 0)   # h_scr + acc
        temps = 3 * tm_ * th_ * 4 + tm_ * th_ * 2              # y, gate, g (+bf16 g)
        return 2 * per_step + scratch + temps                  # double-buffered I/O

    budget_cap = max(vmem_cap - (8 << 20), 16 << 20)
    while _needed_bytes(tm, th) > budget_cap:
        if th > 128:
            th = _pick_tile(H, th - 128)
        elif tm > 16:
            tm = max((tm // 2 // 16) * 16, 16)
        else:
            break

    Tp = _round_up(T, tm)
    n_tok, n_h = Tp // tm, H // th
    assert H % th == 0 and th % 128 == 0

    # ---- activation reshape / padding ----------------------------------------
    x2 = hidden_states.reshape(T, D)
    if has_residual:
        res2 = residual.reshape(T, D)
    if Tp != T:
        x2 = jnp.pad(x2, ((0, Tp - T), (0, 0)))
        if has_residual:
            res2 = jnp.pad(res2, ((0, Tp - T), (0, 0)))

    # ---- specs ----------------------------------------------------------------
    def _col_block(offset):
        return lambda i, j: (0, j + offset)

    tok_spec = pl.BlockSpec((tm, D), lambda i, j: (i, 0))
    in_specs = [tok_spec]                                # hidden_states
    inputs = [x2]
    if has_residual:
        in_specs.append(tok_spec)                        # residual in
        inputs.append(res2)
    in_specs += [
        pl.BlockSpec((1, D), lambda i, j: (0, 0)),       # norm weight
        pl.BlockSpec((D, th), _col_block(0)),            # W1 value tile (fused array)
        pl.BlockSpec((D, th), _col_block(n_h)),          # W1 gate  tile (same array)
        pl.BlockSpec((1, th), _col_block(0)),            # b1 value tile (fused array)
        pl.BlockSpec((1, th), _col_block(n_h)),          # b1 gate  tile (same array)
        pl.BlockSpec((th, D), lambda i, j: (j, 0)),      # W2 row tile
        pl.BlockSpec((1, D), lambda i, j: (0, 0)),       # b2
    ]
    inputs += [wn, w1, w1, b1, b1, w2, b2]

    scratch_shapes = [pltpu.VMEM((tm, D), jnp.bfloat16)]     # cached normalized acts
    if n_h > 1:
        scratch_shapes.append(pltpu.VMEM((tm, D), jnp.float32))  # fc2 accumulator

    needed = _needed_bytes(tm, th)
    vmem_limit = int(min(max(needed * 5 // 4 + (1 << 20), 32 << 20), budget_cap))

    weight_bytes = ((w1.size + w2.size) * 2
                    + (b1.size + b2.size + wn.size) * 4)
    cost = pl.CostEstimate(
        flops=int(6 * Tp * D * H + 4 * Tp * H),
        transcendentals=int(Tp * H),
        bytes_accessed=int(x2.size * x_itemsize
                           + (Tp * D * res_itemsize if has_residual else 0)
                           + weight_bytes * n_tok
                           + Tp * D * (x_itemsize + 4)),
    )

    kernel = functools.partial(_ffn_kernel, eps=eps,
                               has_residual=has_residual, n_h=n_h)

    out2, res_out2 = pl.pallas_call(
        kernel,
        out_shape=(jax.ShapeDtypeStruct((Tp, D), hidden_states.dtype),
                   jax.ShapeDtypeStruct((Tp, D), jnp.float32)),
        grid_spec=pltpu.PrefetchScalarGridSpec(
            num_scalar_prefetch=0,
            grid=(n_tok, n_h),
            in_specs=in_specs,
            out_specs=[
                pl.BlockSpec((tm, D), lambda i, j: (i, 0)),   # mlp output
                pl.BlockSpec((tm, D), lambda i, j: (i, 0)),   # residual (fp32)
            ],
            scratch_shapes=scratch_shapes,
        ),
        compiler_params=pltpu.CompilerParams(
            dimension_semantics=("parallel", "arbitrary"),
            vmem_limit_bytes=vmem_limit,
        ),
        cost_estimate=cost,
    )(*inputs)

    return out2[:T].reshape(B, S, D), res_out2[:T].reshape(B, S, D)


# --------------------------------------------------------------------------- #
# Synthetic params + reference
# --------------------------------------------------------------------------- #
def init_params(key, d_model: int):
    """Deterministic synthetic parameters. fc1: D -> 2H, fc2: H -> D, H = 4*D."""
    H = 4 * d_model
    k1, k2, k3, k4 = jax.random.split(key, 4)
    scale1 = 1.0 / jnp.sqrt(d_model)
    scale2 = 1.0 / jnp.sqrt(H)
    return {
        "norm_w": jnp.ones((1, d_model), jnp.float32),
        "w1": (jax.random.normal(k1, (d_model, 2 * H), jnp.float32) * scale1),
        "b1": (jax.random.normal(k2, (1, 2 * H), jnp.float32) * 0.01),
        "w2": (jax.random.normal(k3, (H, d_model), jnp.float32) * scale2),
        "b2": (jax.random.normal(k4, (1, d_model), jnp.float32) * 0.01),
    }


def _reference(hidden_states, params, residual, eps=1e-5):
    """Module semantics with matmul operands in bf16 / f32 accumulation
    (mirrors the kernel's numerics)."""
    x = hidden_states.astype(jnp.float32)
    res = x if residual is None else x + residual.astype(jnp.float32)
    var = jnp.mean(res * res, axis=-1, keepdims=True)
    h = (res * jax.lax.rsqrt(var + eps) * params["norm_w"][0]).astype(jnp.bfloat16)
    H = params["w2"].shape[0]
    w1 = params["w1"].astype(jnp.bfloat16)
    y = jnp.dot(h, w1[:, :H], preferred_element_type=jnp.float32) + params["b1"][0, :H]
    gate = jnp.dot(h, w1[:, H:], preferred_element_type=jnp.float32) + params["b1"][0, H:]
    g = (y * jax.nn.silu(gate)).astype(jnp.bfloat16)
    out = jnp.dot(g, params["w2"].astype(jnp.bfloat16),
                  preferred_element_type=jnp.float32) + params["b2"][0]
    return out.astype(hidden_states.dtype), res


if __name__ == "__main__":
    B, S, D = 2, 8, 128           # small test shapes: d_model=128 -> H=512
    key = jax.random.PRNGKey(0)
    kx, kr, kp = jax.random.split(key, 3)

    hidden_states = jax.random.normal(kx, (B, S, D), jnp.float32)
    residual = jax.random.normal(kr, (B, S, D), jnp.float32)
    params = init_params(kp, D)
    prepared = prepare_params(params)     # one-time weight cast (reused per call)

    # with residual
    out, res_out = feedforward_wrapper(hidden_states, prepared, residual)
    out = jax.block_until_ready(out)
    res_out = jax.block_until_ready(res_out)
    ref_out, ref_res = _reference(hidden_states, params, residual)
    assert jnp.allclose(res_out, ref_res, atol=1e-5, rtol=1e-5)
    assert jnp.allclose(out, ref_out, atol=2e-3, rtol=2e-3)

    # residual=None variant (no zero residual streamed from HBM)
    out0, res0 = feedforward_wrapper(hidden_states, prepared, None)
    out0 = jax.block_until_ready(out0)
    ref_out0, ref_res0 = _reference(hidden_states, params, None)
    assert jnp.allclose(res0, ref_res0, atol=1e-5, rtol=1e-5)
    assert jnp.allclose(out0, ref_out0, atol=2e-3, rtol=2e-3)

    print("KERNEL_OK")
</pallas_src>

<mosaic_0001>
module attributes {stable_mosaic.version = 11 : i64} {
  func.func @_ffn_kernel(%arg0: i32, %arg1: i32, %arg2: memref<16x128xf32, #tpu.memory_space<vmem>>, %arg3: memref<16x128xf32, #tpu.memory_space<vmem>>, %arg4: memref<1x128xf32, #tpu.memory_space<vmem>>, %arg5: memref<128x256xbf16, #tpu.memory_space<vmem>>, %arg6: memref<128x256xbf16, #tpu.memory_space<vmem>>, %arg7: memref<1x256xf32, #tpu.memory_space<vmem>>, %arg8: memref<1x256xf32, #tpu.memory_space<vmem>>, %arg9: memref<256x128xbf16, #tpu.memory_space<vmem>>, %arg10: memref<1x128xf32, #tpu.memory_space<vmem>>, %arg11: memref<16x128xf32, #tpu.memory_space<vmem>>, %arg12: memref<16x128xf32, #tpu.memory_space<vmem>>, %arg13: memref<16x128xbf16, #tpu.memory_space<vmem>>, %arg14: memref<16x128xf32, #tpu.memory_space<vmem>>) attributes {dimension_semantics = [#tpu.dimension_semantics<parallel>, #tpu.dimension_semantics<arbitrary>], iteration_bounds = array<i64: 1, 2>, scalar_prefetch = 0 : i64, scratch_operands = 2 : i64, tpu.core_type = #tpu.core_type<tc>, window_params = [{transform_indices = @transform_0, window_bounds = array<i64: 16, 128>}, {transform_indices = @transform_1, window_bounds = array<i64: 16, 128>}, {pipeline_mode = #tpu.pipeline_mode<synchronous>, transform_indices = @transform_2, window_bounds = array<i64: 1, 128>}, {transform_indices = @transform_3, window_bounds = array<i64: 128, 256>}, {transform_indices = @transform_4, window_bounds = array<i64: 128, 256>}, {transform_indices = @transform_5, window_bounds = array<i64: 1, 256>}, {transform_indices = @transform_6, window_bounds = array<i64: 1, 256>}, {transform_indices = @transform_7, window_bounds = array<i64: 256, 128>}, {pipeline_mode = #tpu.pipeline_mode<synchronous>, transform_indices = @transform_8, window_bounds = array<i64: 1, 128>}, {transform_indices = @transform_9, window_bounds = array<i64: 16, 128>}, {transform_indices = @transform_10, window_bounds = array<i64: 16, 128>}]} {
    %c0_i32 = arith.constant 0 : i32
    %0 = arith.cmpi eq, %arg1, %c0_i32 : i32
    %1 = arith.extui %0 : i1 to i32
    %c0_i32_0 = arith.constant 0 : i32
    %2 = arith.cmpi ne, %1, %c0_i32_0 : i32
    scf.if %2 {
      %c0_21 = arith.constant 0 : index
      %c0_22 = arith.constant 0 : index
      %35 = vector.load %arg2[%c0_21, %c0_22] : memref<16x128xf32, #tpu.memory_space<vmem>>, vector<16x128xf32>
      %c0_23 = arith.constant 0 : index
      %c0_24 = arith.constant 0 : index
      %36 = vector.load %arg3[%c0_23, %c0_24] : memref<16x128xf32, #tpu.memory_space<vmem>>, vector<16x128xf32>
      %37 = arith.addf %35, %36 : vector<16x128xf32>
      %c0_25 = arith.constant 0 : index
      %c0_26 = arith.constant 0 : index
      %38 = vector.load %arg12[%c0_25, %c0_26] : memref<16x128xf32, #tpu.memory_space<vmem>>, vector<16x128xf32>
      tpu.vector_store %arg12[%c0_25, %c0_26], %37 {strides = array<i32>} : memref<16x128xf32, #tpu.memory_space<vmem>>, vector<16x128xf32>,
      %39 = arith.mulf %37, %37 : vector<16x128xf32>
      %cst_27 = arith.constant dense<0.000000e+00> : vector<16xf32>
      %40 = vector.multi_reduction <add>, %39, %cst_27 [1] : vector<16x128xf32> to vector<16xf32>
      %41 = vector.shape_cast %40 : vector<16xf32> to vector<16x1xf32>
      %cst_28 = arith.constant 1.280000e+02 : f32
      %42 = vector.broadcast %cst_28 : f32 to vector<16x1xf32>
      %43 = arith.divf %41, %42 : vector<16x1xf32>
      %cst_29 = arith.constant 9.99999974E-6 : f32
      %44 = vector.broadcast %cst_29 : f32 to vector<16x1xf32>
      %45 = arith.addf %43, %44 : vector<16x1xf32>
      %46 = math.rsqrt %45 : vector<16x1xf32>
      %47 = vector.broadcast %46 : vector<16x1xf32> to vector<16x128xf32>
      %48 = arith.mulf %37, %47 : vector<16x128xf32>
      %c0_30 = arith.constant 0 : index
      %c0_31 = arith.constant 0 : index
      %49 = vector.load %arg4[%c0_30, %c0_31] : memref<1x128xf32, #tpu.memory_space<vmem>>, vector<1x128xf32>
      %50 = vector.broadcast %49 : vector<1x128xf32> to vector<16x128xf32>
      %51 = arith.mulf %48, %50 : vector<16x128xf32>
      %52 = arith.truncf %51 : vector<16x128xf32> to vector<16x128xbf16>
      %c0_32 = arith.constant 0 : index
      %c0_33 = arith.constant 0 : index
      %53 = vector.load %arg13[%c0_32, %c0_33] : memref<16x128xbf16, #tpu.memory_space<vmem>>, vector<16x128xbf16>
      tpu.vector_store %arg13[%c0_32, %c0_33], %52 {strides = array<i32>} : memref<16x128xbf16, #tpu.memory_space<vmem>>, vector<16x128xbf16>,
    } else {
    }
    %c0 = arith.constant 0 : index
    %c0_1 = arith.constant 0 : index
    %3 = vector.load %arg13[%c0, %c0_1] : memref<16x128xbf16, #tpu.memory_space<vmem>>, vector<16x128xbf16>
    %c0_2 = arith.constant 0 : index
    %c0_3 = arith.constant 0 : index
    %4 = vector.load %arg5[%c0_2, %c0_3] : memref<128x256xbf16, #tpu.memory_space<vmem>>, vector<128x256xbf16>
    %cst = arith.constant dense<0.000000e+00> : vector<16x256xf32>
    %5 = tpu.matmul %3, %4, %cst {dimension_numbers = #tpu.dot_dimension_numbers<[1], [0], [0], [1], [0, 0, 1, 1], [], []>} : vector<16x128xbf16>, vector<128x256xbf16>, vector<16x256xf32> -> vector<16x256xf32>
    %c0_4 = arith.constant 0 : index
    %c0_5 = arith.constant 0 : index
    %6 = vector.load %arg7[%c0_4, %c0_5] : memref<1x256xf32, #tpu.memory_space<vmem>>, vector<1x256xf32>
    %7 = vector.broadcast %6 : vector<1x256xf32> to vector<16x256xf32>
    %8 = arith.addf %5, %7 : vector<16x256xf32>
    %c0_6 = arith.constant 0 : index
    %c0_7 = arith.constant 0 : index
    %9 = vector.load %arg6[%c0_6, %c0_7] : memref<128x256xbf16, #tpu.memory_space<vmem>>, vector<128x256xbf16>
    %cst_8 = arith.constant dense<0.000000e+00> : vector<16x256xf32>
    %10 = tpu.matmul %3, %9, %cst_8 {dimension_numbers = #tpu.dot_dimension_numbers<[1], [0], [0], [1], [0, 0, 1, 1], [], []>} : vector<16x128xbf16>, vector<128x256xbf16>, vector<16x256xf32> -> vector<16x256xf32>
    %c0_9 = arith.constant 0 : index
    %c0_10 = arith.constant 0 : index
    %11 = vector.load %arg8[%c0_9, %c0_10] : memref<1x256xf32, #tpu.memory_space<vmem>>, vector<1x256xf32>
    %12 = vector.broadcast %11 : vector<1x256xf32> to vector<16x256xf32>
    %13 = arith.addf %10, %12 : vector<16x256xf32>
    %14 = arith.negf %13 : vector<16x256xf32>
    %15 = math.exp %14 : vector<16x256xf32>
    %cst_11 = arith.constant 1.000000e+00 : f32
    %16 = vector.broadcast %cst_11 : f32 to vector<16x256xf32>
    %17 = arith.addf %16, %15 : vector<16x256xf32>
    %18 = arith.divf %16, %17 : vector<16x256xf32>
    %19 = arith.mulf %13, %18 : vector<16x256xf32>
    %20 = arith.mulf %8, %19 : vector<16x256xf32>
    %21 = arith.truncf %20 : vector<16x256xf32> to vector<16x256xbf16>
    %c0_12 = arith.constant 0 : index
    %c0_13 = arith.constant 0 : index
    %22 = vector.load %arg9[%c0_12, %c0_13] : memref<256x128xbf16, #tpu.memory_space<vmem>>, vector<256x128xbf16>
    %cst_14 = arith.constant dense<0.000000e+00> : vector<16x128xf32>
    %23 = tpu.matmul %21, %22, %cst_14 {dimension_numbers = #tpu.dot_dimension_numbers<[1], [0], [0], [1], [0, 0, 1, 1], [], []>} : vector<16x256xbf16>, vector<256x128xbf16>, vector<16x128xf32> -> vector<16x128xf32>
    %c0_i32_15 = arith.constant 0 : i32
    %24 = arith.cmpi eq, %arg1, %c0_i32_15 : i32
    %25 = arith.extui %24 : i1 to i32
    %c0_i32_16 = arith.constant 0 : i32
    %26 = arith.cmpi ne, %25, %c0_i32_16 : i32
    scf.if %26 {
      %c0_21 = arith.constant 0 : index
      %c0_22 = arith.constant 0 : index
      %35 = vector.load %arg14[%c0_21, %c0_22] : memref<16x128xf32, #tpu.memory_space<vmem>>, vector<16x128xf32>
      tpu.vector_store %arg14[%c0_21, %c0_22], %23 {strides = array<i32>} : memref<16x128xf32, #tpu.memory_space<vmem>>, vector<16x128xf32>,
    } else {
    }
    %c0_i32_17 = arith.constant 0 : i32
    %27 = arith.cmpi sgt, %arg1, %c0_i32_17 : i32
    %c1_i32 = arith.constant 1 : i32
    %28 = arith.cmpi slt, %arg1, %c1_i32 : i32
    %29 = arith.andi %27, %28 : i1
    %30 = arith.extui %29 : i1 to i32
    %c0_i32_18 = arith.constant 0 : i32
    %31 = arith.cmpi ne, %30, %c0_i32_18 : i32
    scf.if %31 {
      %c0_21 = arith.constant 0 : index
      %c0_22 = arith.constant 0 : index
      %35 = vector.load %arg14[%c0_21, %c0_22] : memref<16x128xf32, #tpu.memory_space<vmem>>, vector<16x128xf32>
      %36 = arith.addf %35, %23 : vector<16x128xf32>
      %c0_23 = arith.constant 0 : index
      %c0_24 = arith.constant 0 : index
      %37 = vector.load %arg14[%c0_23, %c0_24] : memref<16x128xf32, #tpu.memory_space<vmem>>, vector<16x128xf32>
      tpu.vector_store %arg14[%c0_23, %c0_24], %36 {strides = array<i32>} : memref<16x128xf32, #tpu.memory_space<vmem>>, vector<16x128xf32>,
    } else {
    }
    %c1_i32_19 = arith.constant 1 : i32
    %32 = arith.cmpi eq, %arg1, %c1_i32_19 : i32
    %33 = arith.extui %32 : i1 to i32
    %c0_i32_20 = arith.constant 0 : i32
    %34 = arith.cmpi ne, %33, %c0_i32_20 : i32
    scf.if %34 {
      %c0_21 = arith.constant 0 : index
      %c0_22 = arith.constant 0 : index
      %35 = vector.load %arg14[%c0_21, %c0_22] : memref<16x128xf32, #tpu.memory_space<vmem>>, vector<16x128xf32>
      %36 = arith.addf %35, %23 : vector<16x128xf32>
      %c0_23 = arith.constant 0 : index
      %c0_24 = arith.constant 0 : index
      %37 = vector.load %arg10[%c0_23, %c0_24] : memref<1x128xf32, #tpu.memory_space<vmem>>, vector<1x128xf32>
      %38 = vector.broadcast %37 : vector<1x128xf32> to vector<16x128xf32>
      %39 = arith.addf %36, %38 : vector<16x128xf32>
      %c0_25 = arith.constant 0 : index
      %c0_26 = arith.constant 0 : index
      %40 = vector.load %arg11[%c0_25, %c0_26] : memref<16x128xf32, #tpu.memory_space<vmem>>, vector<16x128xf32>
      tpu.vector_store %arg11[%c0_25, %c0_26], %39 {strides = array<i32>} : memref<16x128xf32, #tpu.memory_space<vmem>>, vector<16x128xf32>,
    } else {
    }
    return
  }
  func.func @transform_0(%arg0: i32, %arg1: i32) -> (i32, i32) {
    %c0_i32 = arith.constant 0 : i32
    %c0_i32_0 = arith.constant 0 : i32
    return %arg0, %c0_i32 : i32, i32
  }
  func.func @transform_1(%arg0: i32, %arg1: i32) -> (i32, i32) {
    %c0_i32 = arith.constant 0 : i32
    %c0_i32_0 = arith.constant 0 : i32
    return %arg0, %c0_i32 : i32, i32
  }
  func.func @transform_2(%arg0: i32, %arg1: i32) -> (i32, i32) {
    %c0_i32 = arith.constant 0 : i32
    %c0_i32_0 = arith.constant 0 : i32
    %c0_i32_1 = arith.constant 0 : i32
    return %c0_i32, %c0_i32_0 : i32, i32
  }
  func.func @transform_3(%arg0: i32, %arg1: i32) -> (i32, i32) {
    %c0_i32 = arith.constant 0 : i32
    %0 = arith.addi %arg1, %c0_i32 : i32
    %c0_i32_0 = arith.constant 0 : i32
    %c0_i32_1 = arith.constant 0 : i32
    return %c0_i32_0, %0 : i32, i32
  }
  func.func @transform_4(%arg0: i32, %arg1: i32) -> (i32, i32) {
    %c2_i32 = arith.constant 2 : i32
    %0 = arith.addi %arg1, %c2_i32 : i32
    %c0_i32 = arith.constant 0 : i32
    %c0_i32_0 = arith.constant 0 : i32
    return %c0_i32, %0 : i32, i32
  }
  func.func @transform_5(%arg0: i32, %arg1: i32) -> (i32, i32) {
    %c0_i32 = arith.constant 0 : i32
    %0 = arith.addi %arg1, %c0_i32 : i32
    %c0_i32_0 = arith.constant 0 : i32
    %c0_i32_1 = arith.constant 0 : i32
    return %c0_i32_0, %0 : i32, i32
  }
  func.func @transform_6(%arg0: i32, %arg1: i32) -> (i32, i32) {
    %c2_i32 = arith.constant 2 : i32
    %0 = arith.addi %arg1, %c2_i32 : i32
    %c0_i32 = arith.constant 0 : i32
    %c0_i32_0 = arith.constant 0 : i32
    return %c0_i32, %0 : i32, i32
  }
  func.func @transform_7(%arg0: i32, %arg1: i32) -> (i32, i32) {
    %c0_i32 = arith.constant 0 : i32
    %c0_i32_0 = arith.constant 0 : i32
    return %arg1, %c0_i32 : i32, i32
  }
  func.func @transform_8(%arg0: i32, %arg1: i32) -> (i32, i32) {
    %c0_i32 = arith.constant 0 : i32
    %c0_i32_0 = arith.constant 0 : i32
    %c0_i32_1 = arith.constant 0 : i32
    return %c0_i32, %c0_i32_0 : i32, i32
  }
  func.func @transform_9(%arg0: i32, %arg1: i32) -> (i32, i32) {
    %c0_i32 = arith.constant 0 : i32
    %c0_i32_0 = arith.constant 0 : i32
    return %arg0, %c0_i32 : i32, i32
  }
  func.func @transform_10(%arg0: i32, %arg1: i32) -> (i32, i32) {
    %c0_i32 = arith.constant 0 : i32
    %c0_i32_0 = arith.constant 0 : i32
    return %arg0, %c0_i32 : i32, i32
  }
}

</mosaic_0001>

<bundles_post_ra>
// kernel: tpu_custom_call.1
= control target key start
LH: loop header
LB: loop body
LE: loop exit
PB: predicated region body
PF: predicated region fallthrough
CT: control target
= control target key end

     0   :  { %s2502_s0 = inlined_call_operand.hbm [shape: f32[16,128], index: 0, kind: input, shape index: {}]   ;;  %s2503_s1 = inlined_call_operand.hbm [shape: f32[16,128], index: 1, kind: input, shape index: {}]   ;;  %s2504_s2 = inlined_call_operand.vmem [shape: f32[1,128], index: 2, kind: input, shape index: {}]   ;;  %s2505_s3 = inlined_call_operand.hbm [shape: bf16[128,1024], index: 3, kind: input, shape index: {}]   ;;  %s2506_s4 = inlined_call_operand.hbm [shape: bf16[128,1024], index: 4, kind: input, shape index: {}]   ;;  %s2507_s5 = inlined_call_operand.vmem [shape: f32[1,1024], index: 5, kind: input, shape index: {}]   ;;  %s2508_s6 = inlined_call_operand.vmem [shape: f32[1,1024], index: 6, kind: input, shape index: {}]   ;;  %s2509_s7 = inlined_call_operand.hbm [shape: bf16[512,128], index: 7, kind: input, shape index: {}]   ;;  %s2510_s8 = inlined_call_operand.vmem [shape: f32[1,128], index: 8, kind: input, shape index: {}]   ;;  %s2511_s9 = inlined_call_operand.hbm [shape: f32[16,128], index: 9, kind: output, shape index: {0}]   ;;  %s2512_s10 = inlined_call_operand.hbm [shape: f32[16,128], index: 10, kind: output, shape index: {1}]  }
   0x1   :  { %2538 = sst [smem:[#allocation29_spill]] %s2502_s0 }
   0x2   :  { %2539 = sst [smem:[#allocation30_spill]] %s2504_s2 }
   0x3   :  { %2540 = sst [smem:[#allocation31_spill]] %s2505_s3 }
   0x4   :  { %2541 = sst [smem:[#allocation32_spill]] %s2507_s5 }
   0x5   :  { %2542 = sst [smem:[#allocation33_spill]] %s2508_s6 }
   0x6   :  { %2543 = sst [smem:[#allocation34_spill]] %s2510_s8 }
   0x7   :  { %2544 = sst [smem:[#allocation35_spill]] %s2511_s9 }
   0x8   :  { %2545 = sst [smem:[#allocation36_spill]] %s2512_s10 }
   0x9   :  { %16 = vsyncpa [#allocation5], 0 }
   0xa   :  { %17 = vsyncpa [#allocation8], 0 }
   0xb   :  { %18 = vsyncpa [#allocation6], 0 }
   0xc   :  { %19 = vsyncpa [#allocation14], 0  ;;  %s2020_s13 = smov 0   ;;  %s2022_s14 = smov 0  }
   0xd   :  { %s2024_s15 = smov 0   ;;  %s2026_s16 = smov 0  }
   0xe   :  { %s2028_s17 = smov 0   ;;  %s2030_s18 = smov 0  }
   0xf   :  { %s2032_s19 = smov 0   ;;  %s2034_s20 = smov 0  }
  0x10   :  { %s2036_s21 = smov 0  }
  0x11 LB: > { %2546 = sst [smem:[#allocation22_spill]] %s1920_s14  ;;  %s2062_s22 = sadd.s32 4294967295, %s1948_s21   ;;  %s1948_s21 = sphi %s2036_s21, %s25_s21   ;;  %s1944_s20 = sphi %s2034_s20, %s2610_s20   ;;  %s1940_s19 = sphi %s2032_s19, %s2609_s19   ;;  %s1936_s18 = sphi %s2030_s18, %s2603_s18   ;;  %s1932_s17 = sphi %s2028_s17, %s2608_s17   ;;  %s1928_s16 = sphi %s2026_s16, %s2607_s16   ;;  %s1924_s15 = sphi %s2024_s15, %s2606_s15   ;;  %s1920_s14 = sphi %s2022_s14, %s2605_s14   ;;  %s1916_s13 = sphi %s2020_s13, %s2600_s13  }
  0x12   : > { %2547 = sst [smem:[#allocation23_spill]] %s1936_s18  ;;  %p124_p0 = scmp.ne.s32.totalorder %s1936_s18, %s1932_s17 }
  0x13   : > { %2548 = sst [smem:[#allocation24_spill]] %s1940_s19  ;;  %p125_p1 = scmp.eq.s32.totalorder %s1948_s21, 0 }
  0x14   : > { %p130_p2 = scmp.ne.s32.totalorder %s1932_s17, %s1928_s16  ;;  %p2515_p3 = scmp.eq.s32.totalorder %s2062_s22, 0 }
  0x15   : > { %p2070_p4 = por %p125_p1, %p124_p0  ;;  %p152_p6 = scmp.ne.s32.totalorder %s1924_s15, %s1920_s14 }
  0x16   : > { %p2077_p5 = por %p2515_p3, %p130_p2  ;;  %p158_p7 = scmp.ne.s32.totalorder %s1920_s14, %s1916_s13 }
  0x17   : > { %p1326_p8 = scmp.ge.s32.totalorder %s1948_s21, 1  ;;  %p2085_p9 = por %p152_p6, %p125_p1 }
  0x18   : > { %s2550_s26 = scalar_select %p2077_p5, 1, 0 }
  0x19   : > { %s2551_s27 = scalar_select %p2085_p9, 1, 0 }
  0x1a   : > { %p322_p10 = scmp.lt.s32.totalorder %s1948_s21, 3  ;;  %p2092_p11 = por %p158_p7, %p2515_p3 }
  0x1b   : > { %s1950_s30 = smov [#allocation4]   ;;  %p2516_p1 = scmp.lt.s32.totalorder %s1948_s21, 2 }
  0x1c   : > { %s2552_s28 = scalar_select %p2092_p11, 1, 0 }
  0x1d   : > { %p2096_p12 = pnand %p1326_p8, %p322_p10  ;;  %s337_s11 = sshll.u32 %s1950_s30, 4  ;;  %s338_s11 = int_to_ptr.vmem [resolvable:$true] %s337_s11 }
  0x1e   : > { %2553 = sst [smem:[#allocation25_spill]] %s2552_s28  ;;  %p2114_p2 = pnand %p2516_p1, %p2070_p4 }
  0x1f   : > { %s2554_s29 = scalar_select %p2096_p12, 1, 0 }
  0x20   : > { %p1457_p13 = pneg %p2096_p12  ;;  %s2557_s0 = sld [smem:[#allocation29_spill]] }
  0x21   : > { %s2556_s16 = scalar_select %p2114_p2, 1, 0 }
  0x22   : > { %p2104_p0 = pnand %p1457_p13, %p2515_p3 }
  0x24   : > { %s2555_s12 = scalar_select %p2104_p0, 1, 0 }
  0x25   : > { %p2532_p7 = pneg %p2104_p0 }
  0x26   : > { %s1651_s23 = scalar_lea.hbm %s2557_s0, 256 }
  0x27   : > { %p1652_p6 = scmp.ne.s32.totalorder %s2557_s0, %s1651_s23  ;;  %p1658_p4 = scmp.lt.u32.totalorder %s1651_s23, %s2557_s0 }
  0x29   : > { %p1654_p8 = pnand %p2532_p7, %p1652_p6 }
  0x2b   : > { %p1655_p10 = pneg %p1654_p8 }
  0x2d   : > { %p1660_p13 = pnand %p1658_p4, %p1655_p10 }
  0x2f   : > { %1663 = shalt.err (!%p1660_p13)
}
  0x30   : > { %s1664_s8 = scalar_lea.vmem %s338_s11, 256  ;;  %p1672_p5 = scmp.lt.s32.totalorder %s338_s11, %s338_s11 }
  0x31   : > { %p1665_p3 = scmp.ne.s32.totalorder %s338_s11, %s1664_s8  ;;  %p1673_p12 = scmp.lt.s32.totalorder %s1664_s8, %s1664_s8 }
  0x33   : > { %p1667_p1 = pnand %p1665_p3, %p2532_p7  ;;  %p1674_p2 = por %p1673_p12, %p1672_p5 }
  0x35   : > { %p1668_p11 = pneg %p1667_p1 }
  0x37   : > { %p1675_p9 = pnand %p1674_p2, %p1668_p11 }
  0x39   : > { %1678 = shalt.err (!%p1675_p9)
}
  0x3a   : > { %s2521_s9 = smov 128   ;;  %s2523_s10 = smov 8  }
  0x3b   : > { %1460 = dma.hbm_to_vmem [thread:$0]  (!%p2104_p0), %s2557_s0, 256, %s338_s11, [#allocation5], %s2521_s9, %s2521_s9, %s2523_s10  }
  0x3c   : > { %p2558_p3 = scmp.ne.s32.totalorder %s2551_s27, 0  ;;  %p2559_p5 = scmp.lt.s32.totalorder %s1948_s21, 2 }
  0x3d   : > { %s34_s13 = sadd.s32 1, %s1944_s20  ;;  %s140_s30 = sadd.s32 2, %s1944_s20 }
  0x3e   : > { %p2147_p9 = pnand %p2559_p5, %p2558_p3  ;;  %p35_p11 = scmp.ge.s32.totalorder %s34_s13, 2 }
  0x3f   : > { %s375_s24 = sand.u32 1, %s1936_s18   ;;  %s2527_s2 = sshll.u32 %s1944_s20, 7 }
  0x40   : > { %s2612_s13 = smov (%p35_p11, %s34_s13), 0  ;;  %s2157_s11 = sshll.u32 %s375_s24, 7 }
  0x41   : > { %2561 = sst [smem:[#allocation26_spill]] %s2612_s13  ;;  %s114_s9 = ssub.s32 %s1944_s20, %s2612_s13 }
  0x42   : > { %s2562_s3 = sld [smem:[#allocation31_spill]]  ;;  %s141_s10 = sadd.s32 2, %s2612_s13 }
  0x43   : > { %p115_p12 = scmp.eq.s32.totalorder %s114_s9, 0  ;;  %s142_s0 = ssub.s32 %s140_s30, %s141_s10 }
  0x44   : > { %p143_p1 = scmp.eq.s32.totalorder %s142_s0, 0  ;;  %s2563_s6 = sadd.s32 1, %s1936_s18 }
  0x45   : > { %s2172_s24 = scalar_select %p115_p12, %s1936_s18, %s2563_s6  }
  0x46   : > { %s2565_s5 = sadd.s32 1, %s1924_s15  ;;  %s377_s27 = scalar_lea.vmem [#allocation9], %s2157_s11 }
  0x47   : > { %2564 = sst [smem:[#allocation27_spill]] %s2172_s24  ;;  %s384_s23 = sshll.u32 %s377_s27, 4  ;;  %s2180_s23 = int_to_ptr.vmem [resolvable:$true] %s384_s23 }
  0x48   : > { %s2164_s8 = scalar_lea.hbm %s2562_s3, %s2527_s2  ;;  %s396_s2 = sand.u32 1, %s1924_s15  }
  0x49   : > { %s2177_s19 = scalar_select %p143_p1, %s1924_s15, %s2565_s5  }
  0x4a   : > { %s2567_s28 = sand.u32 1, %s1948_s21   ;;  %s1679_s13 = scalar_lea.hbm %s2164_s8, 2048 }
  0x4b   : > { %2566 = sst [smem:[#allocation28_spill]] %s2177_s19  ;;  %s2185_s14 = scalar_lea.sflag [#allocation5], %s2567_s28 }
  0x4c   : > { %p1680_p2 = scmp.ne.s32.totalorder %s2164_s8, %s1679_s13  ;;  %p2568_p6 = scmp.ne.s32.totalorder %s2556_s16, 0 }
  0x4d   : > { %s1684_s5 = scalar_lea.hbm %s2562_s3, 8192  ;;  %p1685_p13 = scmp.lt.u32.totalorder %s2164_s8, %s2562_s3 }
  0x4e   : > { %p2536_p8 = pneg %p2568_p6  ;;  %p1686_p3 = scmp.lt.u32.totalorder %s1684_s5, %s1679_s13 }
  0x4f   : > { %p1688_p11 = scmp.lt.u32.totalorder %s1679_s13, %s2164_s8 }
  0x50   : > { %p1682_p10 = pnand %p2536_p8, %p1680_p2  ;;  %p1687_p5 = por %p1686_p3, %p1685_p13 }
  0x52   : > { %p1683_p4 = pneg %p1682_p10  ;;  %p1689_p12 = por %p1688_p11, %p1687_p5 }
  0x54   : > { %p1690_p1 = pnand %p1689_p12, %p1683_p4 }
  0x56   : > { %1693 = shalt.err (!%p1690_p1)
}
  0x57   : > { %s1694_s28 = scalar_lea.vmem %s2180_s23, 2048  ;;  %s1953_s30 = smov [#allocation9]  }
  0x58   : > { %p1695_p2 = scmp.ne.s32.totalorder %s2180_s23, %s1694_s28  ;;  %s1699_s27 = sshll.u32 %s1953_s30, 4  ;;  %s1700_s27 = int_to_ptr.vmem [resolvable:$false] %s1699_s27 }
  0x59   : > { %s1701_s0 = scalar_lea.vmem %s1700_s27, 4096  ;;  %p1702_p0 = scmp.lt.s32.totalorder %s2180_s23, %s1700_s27 }
  0x5a   : > { %p1697_p10 = pnand %p1695_p2, %p2536_p8  ;;  %p1703_p13 = scmp.lt.s32.totalorder %s1701_s0, %s1694_s28 }
  0x5c   : > { %p1698_p7 = pneg %p1697_p10  ;;  %p1704_p3 = por %p1703_p13, %p1702_p0 }
  0x5e   : > { %p1705_p5 = pnand %p1704_p3, %p1698_p7 }
  0x60   : > { %1708 = shalt.err (!%p1705_p5)
}
  0x61   : > { %s1954_s13 = smov 512   ;;  %s2569_s6 = smov 8  }
  0x62   : > { %s2570_s5 = smov 128   ;;  %s1333_s9 = sshll.u32 %s396_s2, 7 }
  0x63   : > { %1467 = dma.hbm_to_vmem [thread:$0]  (!%p2568_p6), %s2164_s8, 2048, %s2180_s23, %s2185_s14, %s1954_s13, %s2570_s5, %s2569_s6  }
  0x64   : > { %s2571_s10 = sshll.u32 %s1944_s20, 7  ;;  %s398_s3 = scalar_lea.vmem [#allocation10], %s1333_s9 }
  0x65   : > { %s1207_s27 = scalar_lea.hbm %s2506_s4, %s2571_s10  ;;  %s406_s24 = sshll.u32 %s398_s3, 4  ;;  %s2225_s24 = int_to_ptr.vmem [resolvable:$true] %s406_s24 }
  0x66   : > { %s2223_s0 = scalar_lea.hbm %s1207_s27, 256  ;;  %s1955_s18 = smov [#allocation7]  }
  0x67   : > { %s2227_s19 = sshll.u32 %s1955_s18, 4  ;;  %s1739_s8 = scalar_lea.hbm %s1207_s27, 2304  ;;  %s354_s19 = int_to_ptr.vmem [resolvable:$true] %s2227_s19 }
  0x68   : > { %p1710_p0 = scmp.ne.s32.totalorder %s2223_s0, %s1739_s8  ;;  %p1711_p7 = pneg %p2147_p9 }
  0x69   : > { %s1714_s10 = scalar_lea.hbm %s2506_s4, 8192  ;;  %p1715_p12 = scmp.lt.u32.totalorder %s2223_s0, %s2506_s4 }
  0x6a   : > { %p1712_p4 = pnand %p1711_p7, %p1710_p0  ;;  %p1716_p1 = scmp.lt.u32.totalorder %s1714_s10, %s1739_s8 }
  0x6b   : > { %p1718_p10 = scmp.lt.u32.totalorder %s1739_s8, %s2223_s0 }
  0x6c   : > { %p1713_p11 = pneg %p1712_p4  ;;  %p1717_p2 = por %p1716_p1, %p1715_p12 }
  0x6e   : > { %p1719_p13 = por %p1718_p10, %p1717_p2 }
  0x70   : > { %p1720_p3 = pnand %p1719_p13, %p1713_p11 }
  0x72   : > { %1723 = shalt.err (!%p1720_p3)
}
  0x73   : > { %s1724_s3 = scalar_lea.vmem %s2225_s24, 2048  ;;  %s1956_s18 = smov [#allocation10]  }
  0x74   : > { %p1725_p5 = scmp.ne.s32.totalorder %s2225_s24, %s1724_s3  ;;  %s1729_s30 = sshll.u32 %s1956_s18, 4  ;;  %s1730_s30 = int_to_ptr.vmem [resolvable:$false] %s1729_s30 }
  0x75   : > { %s1731_s27 = scalar_lea.vmem %s1730_s30, 4096  ;;  %p1732_p8 = scmp.lt.s32.totalorder %s2225_s24, %s1730_s30 }
  0x76   : > { %p1727_p0 = pnand %p1725_p5, %p1711_p7  ;;  %p1733_p12 = scmp.lt.s32.totalorder %s1731_s27, %s1724_s3 }
  0x78   : > { %p1728_p4 = pneg %p1727_p0  ;;  %p1734_p1 = por %p1733_p12, %p1732_p8 }
  0x7a   : > { %p1735_p2 = pnand %p1734_p1, %p1728_p4 }
  0x7c   : > { %1738 = shalt.err (!%p1735_p2)
}
  0x7d   : > { %1470 = dma.hbm_to_vmem [thread:$0]  (!%p2147_p9), %s2223_s0, 2048, %s2225_s24, %s2185_s14, %s1954_s13, %s2570_s5, %s2569_s6  }
  0x7e   : > { %s1740_s23 = scalar_lea.hbm %s2503_s1, 256  ;;  %p2572_p7 = scmp.ne.s32.totalorder %s2555_s12, 0 }
  0x7f   : > { %p1741_p8 = scmp.ne.s32.totalorder %s2503_s1, %s1740_s23  ;;  %p1747_p3 = scmp.lt.u32.totalorder %s1740_s23, %s2503_s1 }
  0x80   : > { %p2573_p11 = pneg %p2572_p7 }
  0x82   : > { %p1743_p10 = pnand %p1741_p8, %p2573_p11 }
  0x84   : > { %p1744_p13 = pneg %p1743_p10 }
  0x86   : > { %p1749_p5 = pnand %p1747_p3, %p1744_p13 }
  0x88   : > { %1752 = shalt.err (!%p1749_p5)
}
  0x89   : > { %s1753_s24 = scalar_lea.vmem %s354_s19, 256  ;;  %p2574_p0 = pmov %p2573_p11 }
  0x8a   : > { %p1754_p9 = scmp.ne.s32.totalorder %s354_s19, %s1753_s24  ;;  %p1761_p1 = scmp.lt.s32.totalorder %s354_s19, %s354_s19 }
  0x8b   : > { %p1762_p2 = scmp.lt.s32.totalorder %s1753_s24, %s1753_s24 }
  0x8c   : > { %p1756_p4 = pnand %p1754_p9, %p2574_p0 }
  0x8d   : > { %p1763_p6 = por %p1762_p2, %p1761_p1 }
  0x8e   : > { %p1757_p12 = pneg %p1756_p4 }
  0x90   : > { %p1764_p8 = pnand %p1763_p6, %p1757_p12 }
  0x92   : > { %1767 = shalt.err (!%p1764_p8)
}
  0x93   : > { %1463 = dma.hbm_to_vmem [thread:$0]  (!%p2572_p7), %s2503_s1, 256, %s354_s19, [#allocation8], %s2570_s5, %s2570_s5, %s2569_s6  }
  0x94   : > { %s1410_s3 = sshll.u32 %s1944_s20, 11  ;;  %s438_s18 = scalar_lea.vmem [#allocation11], %s2157_s11 }
  0x95   : > { %s445_s30 = sshll.u32 %s438_s18, 4  ;;  %s2286_s2 = scalar_lea.hbm %s2509_s7, %s1410_s3  ;;  %s2288_s30 = int_to_ptr.vmem [resolvable:$true] %s445_s30 }
  0x96   : > { %s1768_s12 = scalar_lea.hbm %s2286_s2, 2048  ;;  %p2575_p11 = scmp.ne.s32.totalorder %s2556_s16, 0 }
  0x97   : > { %p1769_p6 = scmp.ne.s32.totalorder %s2286_s2, %s1768_s12  ;;  %s1773_s6 = scalar_lea.hbm %s2509_s7, 4096 }
  0x98   : > { %p2576_p10 = pneg %p2575_p11  ;;  %p1774_p3 = scmp.lt.u32.totalorder %s2286_s2, %s2509_s7 }
  0x99   : > { %p1775_p5 = scmp.lt.u32.totalorder %s1773_s6, %s1768_s12  ;;  %p1777_p0 = scmp.lt.u32.totalorder %s1768_s12, %s2286_s2 }
  0x9a   : > { %p1771_p13 = pnand %p1769_p6, %p2576_p10 }
  0x9b   : > { %p1776_p9 = por %p1775_p5, %p1774_p3 }
  0x9c   : > { %p1772_p7 = pneg %p1771_p13 }
  0x9d   : > { %p1778_p4 = por %p1777_p0, %p1776_p9 }
  0x9f   : > { %p1779_p12 = pnand %p1778_p4, %p1772_p7 }
  0xa1   : > { %1782 = shalt.err (!%p1779_p12)
}
  0xa2   : > { %s1783_s10 = scalar_lea.vmem %s2288_s30, 2048  ;;  %p2577_p2 = pmov %p2576_p10 }
  0xa3   : > { %p1784_p1 = scmp.ne.s32.totalorder %s2288_s30, %s1783_s10  ;;  %s1957_s28 = smov [#allocation11]  }
  0xa4   : > { %s1788_s25 = sshll.u32 %s1957_s28, 4  ;;  %s1789_s25 = int_to_ptr.vmem [resolvable:$false] %s1788_s25 }
  0xa5   : > { %p1786_p8 = pnand %p1784_p1, %p2577_p2  ;;  %s1790_s9 = scalar_lea.vmem %s1789_s25, 4096 }
  0xa6   : > { %p1791_p10 = scmp.lt.s32.totalorder %s2288_s30, %s1789_s25  ;;  %p1792_p13 = scmp.lt.s32.totalorder %s1790_s9, %s1783_s10 }
  0xa7   : > { %p1787_p6 = pneg %p1786_p8 }
  0xa8   : > { %p1793_p3 = por %p1792_p13, %p1791_p10 }
  0xaa   : > { %p1794_p5 = pnand %p1793_p3, %p1787_p6 }
  0xac   : > { %1797 = shalt.err (!%p1794_p5)
}
  0xad   : > { %s1958_s24 = smov 64   ;;  %s1959_s13 = smov 4  }
  0xae   : > { %1473 = dma.hbm_to_vmem [thread:$0]  (!%p2575_p11), %s2286_s2, 2048, %s2288_s30, %s2185_s14, %s1958_s24, %s1958_s24, %s1959_s13  }
  0xaf   : > { %p2578_p7 = scmp.ne.s32.totalorder %s2554_s29, 0 }
  0xb0   : > { %p2579_p9 = scmp.eq.s32.totalorder (!%p2578_p7), %s2062_s22, 0 }
  0xb1   : > { %457 = sbr.rel (%p2578_p7) target bundleno = 985 (0x3d9), region = 56 }
  0xb8   : > { %1887 = dma.done.wait (%p2579_p9), [#allocation5], 256   ;;  %p2580_p0 = pmov %p2579_p9 }
  0xba   : > { %1889 = vsyncadd (%p2580_p0), [#allocation5], 4294967040  ;;  %p2581_p4 = pmov %p2580_p0 }
  0xbb   : > { %p2582_p12 = pmov %p2580_p0 }
  0xbc   : > { %1891 = dma.done.wait (%p2581_p4), [#allocation8], 256  }
  0xbd   : > { %1893 = vsyncadd (%p2582_p12), [#allocation8], 4294967040  ;;  %s467_s16 = sand.u32 1, %s2062_s22   ;;  %s469_s14 = sand.u32 1, %s1932_s17  }
  0xbe   : > { %s1341_s0 = sshll.u32 %s469_s14, 7  ;;  %s468_s29 = scalar_lea.sflag [#allocation5], %s467_s16 }
  0xbf   : > { %s2326_s3 = scalar_lea.vmem [#allocation9], %s1341_s0  ;;  %p2583_p11 = scmp.ne.s32.totalorder %s2550_s26, 0 }
  0xc1   : > { %1895 = dma.done.wait (%p2583_p11), %s468_s29, 2048  }
  0xc2   : > { %1897 = vsyncadd (%p2583_p11), %s468_s29, 4294965248  ;;  %s2584_s18 = sld [smem:[#allocation22_spill]]  ;;  %s2585_s30 = sld [smem:[#allocation25_spill]] }
  0xc8   : > { %s478_s27 = sand.u32 1, %s2584_s18   ;;  %p2586_p1 = scmp.ne.s32.totalorder %s2585_s30, 0 }
  0xc9   : > { %s1342_s8 = sshll.u32 %s478_s27, 7 }
  0xca   : > { %s2333_s2 = scalar_lea.vmem [#allocation10], %s1342_s8 }
  0xcb   : > { %1899 = dma.done.wait (%p2586_p1), %s468_s29, 2048  }
  0xcc   : > { %1901 = vsyncadd (%p2586_p1), %s468_s29, 4294965248  ;;  %s2339_s12 = scalar_lea.vmem [#allocation11], %s1341_s0 }
  0xcd   : > { %1903 = dma.done.wait (%p2583_p11), %s468_s29, 2048  }
  0xce   : > { %1905 = vsyncadd (%p2583_p11), %s468_s29, 4294965248  ;;  %s2587_s19 = sld [smem:[#allocation24_spill]]  ;;  %s2588_s10 = sld [smem:[#allocation32_spill]] }
  0xcf   : > { %s2589_s24 = sld [smem:[#allocation33_spill]] }
  0xd4   : > { %s1344_s11 = sshll.u32 %s2587_s19, 1  ;;  %p1346_p6 = scmp.ne.s32.totalorder %s2587_s19, 0 }
  0xd5   : > { %p546_p2 = scmp.lt.s32.totalorder %s1344_s11, 7  ;;  %s1412_s6 = sadd.s32 4, %s1344_s11  ;;  %v565_v0 = vld [vmem:[#allocation4] sm:$0xff] (!%p1346_p6)  ;;  %v567_v1 = vld [vmem:[#allocation7] sm:$0xff] (!%p1346_p6)  ;;  %v566_v2 = vld [vmem:[#allocation4 + $0x8] sm:$0xff] (!%p1346_p6) }
  0xd6   : > { %p552_p8 = scmp.lt.s32.totalorder %s1412_s6, 7  ;;  %564 = sbr.rel (%p1346_p6) target bundleno = 386 (0x182), region = 80  ;;  %v569_v3 = vadd.f32 (!%p1346_p6), %v567_v1, %v565_v0  ;;  %v568_v4 = vld [vmem:[#allocation7 + $0x8] sm:$0xff] (!%p1346_p6) }
  0xd7   : > { %s2614_s11 = smov (!%p546_p2, %s1344_s11), 7  ;;  %v570_v5 = vadd.f32 (!%p1346_p6), %v568_v4, %v566_v2  ;;  %s2590_s14 = sld [smem:[#allocation30_spill]] (!%p1346_p6) }
  0xd8   : > { %s2616_s6 = smov (!%p552_p8, %s1412_s6), 7  ;;  %s548_s28 = scalar_lea.vmem %s2588_s10, %s2614_s11  ;;  %v573_v6 = vmul.f32 (!%p1346_p6), %v569_v3, %v569_v3  ;;  %571 = vst [vmem:[#allocation13] sm:$0xff] (!%p1346_p6), %v569_v3 }
  0xd9   : > { %s554_s26 = scalar_lea.vmem %s2589_s24, %s2616_s6  ;;  %572 = vst [vmem:[#allocation13 + $0x8] sm:$0xff] (!%p1346_p6), %v570_v5  ;;  %v574_v7 = vmul.f32 (!%p1346_p6), %v570_v5, %v570_v5 }
  0xda   : > { %575 = vadd.xlane.f32.xlu0 (!%p1346_p6), %v573_v6 }
  0xdd   : > { %v1347_v17 = vld [vmem:[%s2590_s14] ss:$0 sm:$0xff] }
  0xde   : > { %577 = vadd.xlane.f32.xlu0 %v574_v7 }
 0x167   : > { %v576_v8 = vpop.xlane.xlu0 %575 }
 0x168   : > { %v580_v9 = vmul.f32 0.0078125, %v576_v8 }
 0x16a   : > { %v582_v10 = vadd.f32 1e-05, %v580_v9 }
 0x16b   : > { %v578_v11 = vpop.xlane.xlu0 %577 }
 0x16c   : > { %1567 = vrsqrt.f32 %v582_v10  ;;  %v581_v12 = vmul.f32 0.0078125, %v578_v11 }
 0x16e   : > { %v583_v13 = vadd.f32 1e-05, %v581_v12 }
 0x170   : > { %1569 = vrsqrt.f32 %v583_v13 }
 0x176   : > { %v1568_v14 = vpop.eup %1567 }
 0x177   : > { %v586_v15 = vmul.f32 %v1568_v14, %v569_v3 }
 0x179   : > { %v595_v19 = vmul.f32 %v1347_v17, %v586_v15 }
 0x17a   : > { %v1570_v16 = vpop.eup %1569 }
 0x17b   : > { %v587_v18 = vmul.f32 %v1570_v16, %v570_v5 }
 0x17d   : > { %v596_v20 = vmul.f32 %v1347_v17, %v587_v18 }
 0x17f   : > { %v597_v21 = vpack.c.bf16 %v596_v20, %v595_v19 }
 0x181   : > { %598 = vst [vmem:[#allocation2] sm:$0xff] %v597_v21 }
 0x182 PF: > { %v1571_v22 = vld [vmem:[%s2333_s2 + $0x4] ss:$8 sps:$4 sm:$0xff]   ;;  %v1573_v23 = vld [vmem:[%s2333_s2] ss:$8 sps:$4 sm:$0xff]   ;;  %v1960_v24 = vmov 0   ;;  %v1623_v60 = vld [vmem:[%s2339_s12 + $0x50] sm:$0xff]   ;;  %v618_v8 = vlaneseq }
 0x183   : > { %891 = vmatprep.mubr.bf16.mxu1 %v1960_v24  ;;  %740 = vmatprep.mubr.bf16.mxu0 %v1960_v24  ;;  %v1574_v25 = vld [vmem:[%s2333_s2 + $0x14] ss:$8 sps:$4 sm:$0xff]   ;;  %v1576_v26 = vld [vmem:[%s2333_s2 + $0x10] ss:$8 sps:$4 sm:$0xff]   ;;  %v1577_v27 = vld [vmem:[%s2333_s2 + $0x24] ss:$8 sps:$4 sm:$0xff]  }
 0x184   : > { %859 = vmatprep.subr.bf16.mxu1 %v1571_v22  ;;  %v1579_v28 = vld [vmem:[%s2333_s2 + $0x20] ss:$8 sps:$4 sm:$0xff]   ;;  %v1580_v29 = vld [vmem:[%s2333_s2 + $0x34] ss:$8 sps:$4 sm:$0xff]   ;;  %v1591_v30 = vld [vmem:[%s2326_s3 + $0x4] ss:$8 sps:$4 sm:$0xff]  }
 0x185   : > { %860 = vmatpush1.bf16.msra.mxu1 %v1573_v23  ;;  %v1594_v31 = vld [vmem:[%s2326_s3] ss:$8 sps:$4 sm:$0xff]   ;;  %v1582_v32 = vld [vmem:[%s2333_s2 + $0x30] ss:$8 sps:$4 sm:$0xff]   ;;  %708 = vmatprep.subr.bf16.mxu0 %v1591_v30  ;;  %v1583_v33 = vld [vmem:[%s2333_s2 + $0x44] ss:$8 sps:$4 sm:$0xff]  }
 0x186   : > { %861 = vmatprep.subr.bf16.mxu1 %v1574_v25  ;;  %709 = vmatpush1.bf16.msra.mxu0 %v1594_v31  ;;  %v1597_v34 = vld [vmem:[%s2326_s3 + $0x14] ss:$8 sps:$4 sm:$0xff]   ;;  %v1600_v35 = vld [vmem:[%s2326_s3 + $0x10] ss:$8 sps:$4 sm:$0xff]   ;;  %v1585_v36 = vld [vmem:[%s2333_s2 + $0x40] ss:$8 sps:$4 sm:$0xff]  }
 0x187   : > { %710 = vmatprep.subr.bf16.mxu0 %v1597_v34  ;;  %v1601_v37 = vld [vmem:[%s2326_s3 + $0x24] ss:$8 sps:$4 sm:$0xff]   ;;  %v1586_v38 = vld [vmem:[%s2333_s2 + $0x54] ss:$8 sps:$4 sm:$0xff]   ;;  %v1603_v39 = vld [vmem:[%s2326_s3 + $0x20] ss:$8 sps:$4 sm:$0xff]  }
 0x188   : > { %v1604_v40 = vld [vmem:[%s2326_s3 + $0x34] ss:$8 sps:$4 sm:$0xff]   ;;  %v1588_v41 = vld [vmem:[%s2333_s2 + $0x50] ss:$8 sps:$4 sm:$0xff]   ;;  %v1589_v42 = vld [vmem:[%s2333_s2 + $0x64] ss:$8 sps:$4 sm:$0xff]  }
 0x189   : > { %862 = vmatpush1.bf16.msra.mxu1 %v1576_v26  ;;  %v1606_v43 = vld [vmem:[%s2326_s3 + $0x30] ss:$8 sps:$4 sm:$0xff]   ;;  %v1593_v44 = vld [vmem:[%s2333_s2 + $0x60] ss:$8 sps:$4 sm:$0xff]   ;;  %v1607_v45 = vld [vmem:[%s2326_s3 + $0x44] ss:$8 sps:$4 sm:$0xff]  }
 0x18a   : > { %863 = vmatprep.subr.bf16.mxu1 %v1577_v27  ;;  %711 = vmatpush1.bf16.msra.mxu0 %v1600_v35  ;;  %v1595_v46 = vld [vmem:[%s2333_s2 + $0x74] ss:$8 sps:$4 sm:$0xff]   ;;  %v1609_v47 = vld [vmem:[%s2326_s3 + $0x40] ss:$8 sps:$4 sm:$0xff]   ;;  %v1599_v49 = vld [vmem:[%s2333_s2 + $0x70] ss:$8 sps:$4 sm:$0xff]  }
 0x18b   : > { %712 = vmatprep.subr.bf16.mxu0 %v1601_v37  ;;  %v1610_v48 = vld [vmem:[%s2326_s3 + $0x54] ss:$8 sps:$4 sm:$0xff]   ;;  %v1612_v50 = vld [vmem:[%s2326_s3 + $0x50] ss:$8 sps:$4 sm:$0xff]   ;;  %v1613_v51 = vld [vmem:[%s2326_s3 + $0x64] ss:$8 sps:$4 sm:$0xff]  }
 0x18c   : > { %v599_v52 = vld [vmem:[#allocation2] sm:$0xff]  ;;  %v1616_v54 = vld [vmem:[%s2326_s3 + $0x74] ss:$8 sps:$4 sm:$0xff]   ;;  %v1618_v55 = vld [vmem:[%s2326_s3 + $0x70] ss:$8 sps:$4 sm:$0xff]   ;;  %v619_v9 = vshrl.u32 %v618_v8, 7 }
 0x18d   : > { %864 = vmatpush1.bf16.msra.mxu1 %v1579_v28  ;;  %v1615_v53 = vld [vmem:[%s2326_s3 + $0x60] ss:$8 sps:$4 sm:$0xff]   ;;  %v1624_v61 = vld [vmem:[%s2339_s12 + $0x10] sm:$0xff]   ;;  %v1625_v62 = vld [vmem:[%s2339_s12 + $0x58] sm:$0xff]  }
 0x18e   : > { %865 = vmatprep.subr.bf16.mxu1 %v1580_v29  ;;  %713 = vmatpush1.bf16.msra.mxu0 %v1603_v39  ;;  %v1619_v56 = vld [vmem:[%s2339_s12 + $0x40] sm:$0xff]   ;;  %v1621_v58 = vld [vmem:[%s2339_s12 + $0x48] sm:$0xff]   ;;  %v1626_v63 = vld [vmem:[%s2339_s12 + $0x18] sm:$0xff]   ;;  %v620_v10 = vsub.s32 0, %v619_v9  ;;  %v624_v12 = vsub.s32 1, %v619_v9 }
 0x18f   : > { %714 = vmatprep.subr.bf16.mxu0 %v1604_v40  ;;  %v1620_v57 = vld [vmem:[%s2339_s12] sm:$0xff]   ;;  %v1622_v59 = vld [vmem:[%s2339_s12 + $0x8] sm:$0xff]   ;;  %v1631_v4 = vld [vmem:[%s2339_s12 + $0x70] sm:$0xff]  }
 0x190   : > { %v1627_v0 = vld [vmem:[%s2339_s12 + $0x60] sm:$0xff]   ;;  %v1629_v2 = vld [vmem:[%s2339_s12 + $0x68] sm:$0xff]   ;;  %v1632_v5 = vld [vmem:[%s2339_s12 + $0x30] sm:$0xff]  }
 0x191   : > { %866 = vmatpush1.bf16.msra.mxu1 %v1582_v32  ;;  %v1628_v1 = vld [vmem:[%s2339_s12 + $0x20] sm:$0xff]   ;;  %v1630_v3 = vld [vmem:[%s2339_s12 + $0x28] sm:$0xff]   ;;  %v1633_v6 = vld [vmem:[%s2339_s12 + $0x78] sm:$0xff]  }
 0x192   : > { %867 = vmatprep.subr.bf16.mxu1 %v1583_v33  ;;  %715 = vmatpush1.bf16.msra.mxu0 %v1606_v43  ;;  %v1634_v7 = vld [vmem:[%s2339_s12 + $0x38] sm:$0xff]   ;;  %v767_v11 = vld [vmem:[%s554_s26] sm:$0x3] }
 0x193   : > { %716 = vmatprep.subr.bf16.mxu0 %v1607_v45  ;;  %v772_v13 = vrot.slane %v767_v11, %v620_v10  ;;  %v776_v14 = vrot.slane %v767_v11, %v624_v12  ;;  %v616_v39 = vld [vmem:[%s548_s28] sm:$0x3] }
 0x194   : > { %v621_v40 = vrot.slane %v616_v39, %v620_v10 }
 0x195   : > { %868 = vmatpush1.bf16.msra.mxu1 %v1585_v36 }
 0x196   : > { %869 = vmatprep.subr.bf16.mxu1 %v1586_v38  ;;  %717 = vmatpush1.bf16.msra.mxu0 %v1609_v47 }
 0x197   : > { %718 = vmatprep.subr.bf16.mxu0 %v1610_v48 }
 0x199   : > { %870 = vmatpush1.bf16.msra.mxu1 %v1588_v41  ;;  %v625_v41 = vrot.slane %v616_v39, %v624_v12 }
 0x19a   : > { %871 = vmatprep.subr.bf16.mxu1 %v1589_v42  ;;  %719 = vmatpush1.bf16.msra.mxu0 %v1612_v50 }
 0x19b   : > { %720 = vmatprep.subr.bf16.mxu0 %v1613_v51 }
 0x19d   : > { %872 = vmatpush1.bf16.msra.mxu1 %v1593_v44 }
 0x19e   : > { %873 = vmatprep.subr.bf16.mxu1 %v1595_v46  ;;  %721 = vmatpush1.bf16.msra.mxu0 %v1615_v53 }
 0x19f   : > { %722 = vmatprep.subr.bf16.mxu0 %v1616_v54 }
 0x1a1   : > { %874 = vmatpush1.bf16.msra.mxu1 %v1599_v49 }
 0x1a2   : > { %723 = vmatpush1.bf16.msra.mxu0 %v1618_v55 }
 0x1a3   : > { %1413 = vmatprep.subr.bf16.mxu0 %v1619_v56 }
 0x1a4   : > { %892 = vmatmul.mubr.bf16.vlgmr.msra.gmra.mrb[0].mxu1 %v599_v52 }
 0x1a5   : > { %741 = vmatmul.mubr.bf16.vlgmr.msra.gmra.mrb[0].mxu0 %v599_v52 }
 0x1a6   : > { %1414 = vmatpush3.bf16.msra.mxu0 %v1620_v57 }
 0x1a7   : > { %1415 = vmatprep.subr.bf16.mxu0 %v1621_v58 }
 0x1aa   : > { %1416 = vmatpush3.bf16.msra.mxu0 %v1622_v59 }
 0x1ab   : > { %1417 = vmatprep.subr.bf16.mxu0 %v1623_v60 }
 0x1ae   : > { %1418 = vmatpush3.bf16.msra.mxu0 %v1624_v61 }
 0x1af   : > { %1419 = vmatprep.subr.bf16.mxu0 %v1625_v62 }
 0x1b2   : > { %1420 = vmatpush3.bf16.msra.mxu0 %v1626_v63 }
 0x1b3   : > { %1421 = vmatprep.subr.bf16.mxu0 %v1627_v0 }
 0x1b6   : > { %1422 = vmatpush3.bf16.msra.mxu0 %v1628_v1 }
 0x1b7   : > { %1423 = vmatprep.subr.bf16.mxu0 %v1629_v2 }
 0x1ba   : > { %1424 = vmatpush3.bf16.msra.mxu0 %v1630_v3 }
 0x1bb   : > { %1425 = vmatprep.subr.bf16.mxu0 %v1631_v4 }
 0x1be   : > { %1426 = vmatpush3.bf16.msra.mxu0 %v1632_v5 }
 0x1bf   : > { %1427 = vmatprep.subr.bf16.mxu0 %v1633_v6 }
 0x1c2   : > { %1428 = vmatpush3.bf16.msra.mxu0 %v1634_v7 }
 0x277   : > { %v893_v15 = vpop.f32.mrb[0].mxu1 }
 0x278   : > { %v894_v16 = vadd.f32 %v893_v15, %v772_v13  ;;  %v895_v17 = vpop.f32.mrb[1].mxu1  ;;  %v742_v27 = vpop.f32.mrb[0].mxu0 }
 0x279   : > { %v896_v18 = vadd.f32 %v895_v17, %v776_v14  ;;  %v897_v19 = vpop.f32.mrb[2].mxu1  ;;  %v744_v28 = vpop.f32.mrb[1].mxu0  ;;  %v743_v42 = vadd.f32 %v742_v27, %v621_v40 }
 0x27a   : > { %v1380_v20 = vmul.f32 -1.442695, %v894_v16  ;;  %v898_v21 = vadd.f32 %v897_v19, %v772_v13  ;;  %v899_v22 = vpop.f32.mrb[3].mxu1  ;;  %v746_v29 = vpop.f32.mrb[2].mxu0  ;;  %v745_v44 = vadd.f32 %v744_v28, %v625_v41 }
 0x27b   : > { %v1381_v23 = vmul.f32 -1.442695, %v896_v18  ;;  %v900_v24 = vadd.f32 %v899_v22, %v776_v14  ;;  %v748_v30 = vpop.f32.mrb[3].mxu0  ;;  %v747_v52 = vadd.f32 %v746_v29, %v621_v40 }
 0x27c   : > { %1635 = vpow2.f32 %v1380_v20  ;;  %v1382_v25 = vmul.f32 -1.442695, %v898_v21  ;;  %v749_v55 = vadd.f32 %v748_v30, %v625_v41 }
 0x27d   : > { %1637 = vpow2.f32 %v1381_v23  ;;  %v1383_v26 = vmul.f32 -1.442695, %v900_v24 }
 0x27e   : > { %1639 = vpow2.f32 %v1382_v25 }
 0x27f   : > { %1641 = vpow2.f32 %v1383_v26 }
 0x286   : > { %v1636_v31 = vpop.eup %1635 }
 0x287   : > { %v1638_v32 = vpop.eup %1637  ;;  %v914_v33 = vadd.f32 1.0, %v1636_v31 }
 0x288   : > { %v1640_v34 = vpop.eup %1639  ;;  %v915_v35 = vadd.f32 1.0, %v1638_v32 }
 0x289   : > { %v1642_v36 = vpop.eup %1641  ;;  %1643 = vrcp.f32 %v914_v33  ;;  %v916_v37 = vadd.f32 1.0, %v1640_v34 }
 0x28a   : > { %1645 = vrcp.f32 %v915_v35  ;;  %v917_v38 = vadd.f32 1.0, %v1642_v36 }
 0x28b   : > { %1647 = vrcp.f32 %v916_v37 }
 0x28c   : > { %1649 = vrcp.f32 %v917_v38 }
 0x293   : > { %v1644_v43 = vpop.eup %1643 }
 0x294   : > { %v1646_v45 = vpop.eup %1645  ;;  %v926_v46 = vmul.f32 %v1644_v43, %v894_v16 }
 0x295   : > { %v1648_v47 = vpop.eup %1647  ;;  %v927_v48 = vmul.f32 %v1646_v45, %v896_v18 }
 0x296   : > { %v1650_v49 = vpop.eup %1649  ;;  %v928_v50 = vmul.f32 %v1648_v47, %v898_v21  ;;  %v930_v51 = vmul.f32 %v926_v46, %v743_v42 }
 0x297   : > { %v929_v53 = vmul.f32 %v1650_v49, %v900_v24  ;;  %v931_v54 = vmul.f32 %v927_v48, %v745_v44 }
 0x298   : > { %v932_v56 = vmul.f32 %v928_v50, %v747_v52 }
 0x299   : > { %v933_v57 = vmul.f32 %v929_v53, %v749_v55 }
 0x29a   : > { %v934_v58 = vpack.c.bf16 %v932_v56, %v930_v51 }
 0x29b   : > { %v935_v59 = vpack.c.bf16 %v933_v57, %v931_v54 }
 0x29d   : > { %1096 = vmatprep.mubr.bf16.mxu0 %v935_v59 }
 0x29e   : > { %1097 = vmatmul.mubr.bf16.vlgmr.msra.gmra.mrb[4].mxu0 %v934_v58 }
 0x36f   : > { %1107 = sbr.rel (%p1346_p6) target bundleno = 888 (0x378), region = 84 }
 0x371   : > { %v1429_v60 = vpop.f32.mrb[4].mxu0 }
 0x372   : > { %v1430_v61 = vpop.f32.mrb[5].mxu0 }
 0x373   : > { %v1431_v62 = vadd.f32 %v1430_v61, %v1429_v60  ;;  %v1432_v63 = vpop.f32.mrb[6].mxu0 }
 0x374   : > { %v1433_v0 = vpop.f32.mrb[7].mxu0 }
 0x375   : > { %v1434_v1 = vadd.f32 %v1433_v0, %v1432_v63  ;;  %1108 = vst [vmem:[#allocation3] sm:$0xff] (!%p1346_p6), %v1431_v62 }
 0x377   : > { %1109 = vst [vmem:[#allocation3 + $0x8] sm:$0xff] %v1434_v1 }
 0x378 PF: > { %s2594_s2 = sld [smem:[#allocation24_spill]] }
 0x37e   : > { %p1110_p10 = scmp.gt.s32.totalorder %s2594_s2, 0  ;;  %p1111_p13 = scmp.lt.s32.totalorder %s2594_s2, 1 }
 0x380   : > { %p1112_p3 = pnand %p1111_p13, %p1110_p10 }
 0x381   : > { %v1116_v2 = vld [vmem:[#allocation3] sm:$0xff] (!%p1112_p3)  ;;  %v1117_v3 = vld [vmem:[#allocation3 + $0x8] sm:$0xff] (!%p1112_p3) }
 0x382   : > { %1115 = sbr.rel (%p1112_p3) target bundleno = 905 (0x389), region = 88  ;;  %v1118_v4 = vadd.f32 (!%p1112_p3), %v1431_v62, %v1116_v2  ;;  %v1119_v5 = vadd.f32 (!%p1112_p3), %v1434_v1, %v1117_v3 }
 0x384   : > { %1120 = vst [vmem:[#allocation3] sm:$0xff] (!%p1112_p3), %v1118_v4  ;;  %1121 = vst [vmem:[#allocation3 + $0x8] sm:$0xff] (!%p1112_p3), %v1119_v5 }
 0x389 PF: > { %s2595_s12 = sld [smem:[#allocation24_spill]] }
 0x38f   : > { %p1401_p5 = scmp.ne.s32.totalorder %s2595_s12, 1 }
 0x390   : > { %v1126_v6 = vld [vmem:[#allocation3] sm:$0xff] (!%p1401_p5)  ;;  %s2596_s6 = sld [smem:[#allocation34_spill]] (!%p1401_p5)  ;;  %v1127_v8 = vld [vmem:[#allocation3 + $0x8] sm:$0xff] (!%p1401_p5) }
 0x391   : > { %1125 = sbr.rel (%p1401_p5) target bundleno = 922 (0x39a), region = 92  ;;  %v1128_v9 = vadd.f32 (!%p1401_p5), %v1431_v62, %v1126_v6  ;;  %v1129_v10 = vadd.f32 (!%p1401_p5), %v1434_v1, %v1127_v8 }
 0x396   : > { %v1402_v7 = vld [vmem:[%s2596_s6] ss:$0 sm:$0xff] (!%p1401_p5) }
 0x397   : > { %v1137_v11 = vadd.f32 (!%p1401_p5), %v1402_v7, %v1128_v9  ;;  %v1138_v12 = vadd.f32 (!%p1401_p5), %v1402_v7, %v1129_v10 }
 0x399   : > { %1139 = vst [vmem:[#allocation12] sm:$0xff] %v1137_v11  ;;  %1140 = vst [vmem:[#allocation12 + $0x8] sm:$0xff] %v1138_v12 }
 0x39a PF: > { %p1479_p7 = scmp.eq.s32.totalorder %s2062_s22, 1  ;;  %s1961_s5 = smov [#allocation12]  }
 0x39b   : > { %s1150_s23 = sshll.u32 %s1961_s5, 4  ;;  %s1151_s23 = int_to_ptr.vmem [resolvable:$true] %s1150_s23 }
 0x39c   : > { %s1798_s10 = scalar_lea.vmem %s1151_s23, 256  ;;  %p1805_p12 = scmp.lt.s32.totalorder %s1151_s23, %s1151_s23 }
 0x39d   : > { %p1799_p9 = scmp.ne.s32.totalorder %s1151_s23, %s1798_s10  ;;  %p1806_p11 = scmp.lt.s32.totalorder %s1798_s10, %s1798_s10 }
 0x39f   : > { %p1800_p0 = pnand %p1799_p9, %p1479_p7  ;;  %p1807_p1 = por %p1806_p11, %p1805_p12 }
 0x3a1   : > { %p1801_p4 = pneg %p1800_p0 }
 0x3a3   : > { %p1808_p2 = pnand %p1807_p1, %p1801_p4 }
 0x3a5   : > { %1811 = shalt.err (!%p1808_p2)
}
 0x3a6   : > { %s2597_s9 = sld [smem:[#allocation35_spill]] }
 0x3ac   : > { %s1812_s24 = scalar_lea.hbm %s2597_s9, 256 }
 0x3ad   : > { %p1813_p8 = scmp.ne.s32.totalorder %s2597_s9, %s1812_s24  ;;  %p1818_p13 = scmp.lt.u32.totalorder %s1812_s24, %s2597_s9 }
 0x3af   : > { %p1814_p6 = pnand %p1813_p8, %p1479_p7 }
 0x3b1   : > { %p1815_p10 = pneg %p1814_p6 }
 0x3b3   : > { %p1820_p3 = pnand %p1818_p13, %p1815_p10 }
 0x3b5   : > { %1823 = shalt.err (!%p1820_p3)
}
 0x3b6   : > { %s1962_s0 = smov 128   ;;  %s1963_s29 = smov 8  }
 0x3b7   : > { %1450 = dma.vmem_to_hbm [thread:$0]  (%p1479_p7), %s1151_s23, 256, %s2597_s9, [#allocation6], %s1962_s0, %s1962_s0, %s1963_s29  }
 0x3b8   : > { %s1964_s30 = smov [#allocation13]  }
 0x3b9   : > { %s1166_s27 = sshll.u32 %s1964_s30, 4  ;;  %s1167_s27 = int_to_ptr.vmem [resolvable:$true] %s1166_s27 }
 0x3ba   : > { %s1824_s8 = scalar_lea.vmem %s1167_s27, 256  ;;  %p1831_p4 = scmp.lt.s32.totalorder %s1167_s27, %s1167_s27 }
 0x3bb   : > { %p1825_p5 = scmp.ne.s32.totalorder %s1167_s27, %s1824_s8  ;;  %p1832_p12 = scmp.lt.s32.totalorder %s1824_s8, %s1824_s8 }
 0x3bd   : > { %p1826_p9 = pnand %p1825_p5, %p1479_p7  ;;  %p1833_p11 = por %p1832_p12, %p1831_p4 }
 0x3bf   : > { %p1827_p0 = pneg %p1826_p9 }
 0x3c1   : > { %p1834_p1 = pnand %p1833_p11, %p1827_p0 }
 0x3c3   : > { %1837 = shalt.err (!%p1834_p1)
}
 0x3c4   : > { %s2598_s19 = sld [smem:[#allocation36_spill]] }
 0x3ca   : > { %s2599_s11 = smov %s2598_s19  ;;  %s1838_s6 = scalar_lea.hbm %s2598_s19, 256 }
 0x3cb   : > { %p1839_p2 = scmp.ne.s32.totalorder %s2599_s11, %s1838_s6  ;;  %p1844_p10 = scmp.lt.u32.totalorder %s1838_s6, %s2599_s11 }
 0x3cd   : > { %p1840_p8 = pnand %p1839_p2, %p1479_p7 }
 0x3cf   : > { %p1841_p6 = pneg %p1840_p8 }
 0x3d1   : > { %p1846_p13 = pnand %p1844_p10, %p1841_p6 }
 0x3d3   : > { %1849 = shalt.err (!%p1846_p13)
}
 0x3d4   : > { %1452 = dma.vmem_to_hbm [thread:$0]  (%p1479_p7), %s1167_s27, 256, %s2599_s11, [#allocation14], %s1962_s0, %s1962_s0, %s1963_s29  }
 0x3d5   : > { %1907 = dma.done.wait (%p1479_p7), [#allocation6], 256  }
 0x3d6   : > { %1909 = vsyncadd (%p1479_p7), [#allocation6], 4294967040 }
 0x3d7   : > { %1911 = dma.done.wait (%p1479_p7), [#allocation14], 256  }
 0x3d8   : > { %1913 = vsyncadd (%p1479_p7), [#allocation14], 4294967040 }
 0x3d9 PF: > { %s25_s21 = sadd.s32 1, %s1948_s21   ;;  %s2600_s13 = sld [smem:[#allocation22_spill]] }
 0x3da   : > { %p22_p3 = scmp.ge.s32.totalorder %s25_s21, 4   ;;  %s2601_s26 = sld [smem:[#allocation28_spill]] }
 0x3db   : > { %s2602_s0 = sld [smem:[#allocation23_spill]]  ;;  %s2603_s18 = sld [smem:[#allocation27_spill]] }
 0x3dc   : > { %s2604_s29 = sld [smem:[#allocation26_spill]]  ;;  %s2605_s14 = smov %s1924_s15 }
 0x3dd   : > { %s2607_s16 = smov %s1932_s17  ;;  %s2609_s19 = smov %s1944_s20 }
 0x3de   :  { %24 = sbr.rel (!%p22_p3) target bundleno = 17 (0x11), region = 156 }
 0x3e0   : > { %s2606_s15 = smov %s2601_s26 }
 0x3e1   : > { %s2608_s17 = smov %s2602_s0 }
 0x3e2   : > { %s2610_s20 = smov %s2604_s29 }
 0x3e5   :  { %1186 = vsyncpa [#allocation5], 1 }
 0x3e6   :  { %1188 = vsyncpa [#allocation5 + $0x1], 1 }
 0x3e7   :  { %1189 = vsyncpa [#allocation8], 1 }
 0x3e8   :  { %1190 = vsyncpa [#allocation6], 1 }
 0x3e9   :  { %1192 = vsyncpa [#allocation6 + $0x1], 1 }
 0x3ea   :  { %1193 = vsyncpa [#allocation14], 1 }

</bundles_post_ra>
